<compile_context>
chip_gen: v5e
topology: v5e:2x2
jax: 0.10.0
libtpu: 0.0.40
codegen_flags: <defaults>
</compile_context>

<pallas_src>
import functools

import jax
import jax.numpy as jnp
from jax.experimental import pallas as pl
from jax.experimental.pallas import tpu as pltpu


def _dropblock_kernel(seed_ref, x_ref, out_ref, a_ref, b_ref, *, H, W, block_size):
    """seed_ref:        (N, H*W) float32 Bernoulli seed mask in {0, 1} (resident).
       x_ref / out_ref: (N, TC, H*W) channel tile of the input / output.
       a_ref / b_ref:   (N, H*W) float32 VMEM scratch, per-pixel affine coeffs."""
    N = seed_ref.shape[0]
    HW = H * W

    # ---- prologue: run once per core (inner grid index 0) -------------------
    @pl.when(pl.program_id(1) == 0)
    def _prologue():
        m = seed_ref[...]                                   # (N, HW), values in {0, 1}
        idx = jax.lax.broadcasted_iota(jnp.int32, (1, HW), 1)
        col = idx % W                                       # column of each flat pixel

        # F.max_pool2d(kernel=bs, stride=1, padding=bs//2) (+ crop for even bs)
        # covers offsets d in [-(bs//2), (bs-1)//2] along each spatial dim.
        p_lo = block_size // 2
        p_hi = (block_size - 1) // 2

        def padded(v):
            # (N, 3*HW): zero-extended copy so shifts become plain static slices.
            # Zero fill == -inf fill here because the mask values live in {0, 1}.
            z = jnp.zeros_like(v)
            return jnp.concatenate([z, v, z], axis=1)

        # Separable dilation: horizontal (W) pass.
        m_pad = padded(m)
        hmax = m
        for dj in range(-p_lo, p_hi + 1):
            if dj == 0:
                continue
            if abs(dj) < HW:
                shifted = m_pad[:, HW + dj:2 * HW + dj]     # m[:, k+dj], zero-filled
            else:
                shifted = jnp.zeros_like(m)
            # Column validity kills bleed across rows and the image side edges.
            ok = jnp.logical_and(col + dj >= 0, col + dj < W)
            hmax = jnp.maximum(hmax, jnp.where(ok, shifted, 0.0))

        # Vertical (H) pass: whole-row shifts (zero fill == top/bottom edge).
        h_pad = padded(hmax)
        drop = hmax
        for di in range(-p_lo, p_hi + 1):
            d = di * W
            if di == 0:
                continue
            if abs(d) < HW:
                drop = jnp.maximum(drop, h_pad[:, HW + d:2 * HW + d])

        keep = 1.0 - drop                                   # block_mask
        pro = jnp.sum(keep) * (1.0 / float(N * HW))         # block_mask.mean()
        # Division by zero only if every element is dropped — matches PyTorch.
        inv_pro = 1.0 / pro
        a_ref[...] = keep * inv_pro                         # (N, HW)
        b_ref[...] = (drop - 1.0 + pro) * inv_pro           # (N, HW)

    # ---- apply: out = (drop + x*keep - 1 + pro) / pro == x*a + b ------------
    x = x_ref[...].astype(jnp.float32)                      # (N, TC, HW)
    out_ref[...] = (x * a_ref[...][:, None, :]
                    + b_ref[...][:, None, :]).astype(out_ref.dtype)


def _generation_budget():
    """(channel-tile target bytes, scoped-VMEM limit bytes) per TPU generation."""
    try:
        kind = jax.devices()[0].device_kind.lower()
    except Exception:
        kind = ""
    if "v7" in kind or "tpu7" in kind:
        # 3.2 TB/s HBM: 2 MiB steps are dominated by per-step overhead.
        # 8 MiB tiles -> 4 x 8 MiB (in+out, double-buffered) fits 64 MiB/TC.
        return 8 << 20, 48 << 20
    if "v6" in kind:
        return 4 << 20, 32 << 20
    # v5e / unknown: ~0.82 TB/s, 2 MiB tiles already keep overhead < 7%.
    return 2 << 20, 32 << 20


def _pick_channel_tile(N, C, HW, elem_bytes, target_bytes):
    """Channel-tile size (2nd-minor dim of the (N, tc, HW) block)."""
    sub = max(8, 32 // max(1, elem_bytes))   # sublane tile: 8 f32 / 16 bf16 / 32 int8
    if C <= sub:
        return C                             # must be sublane-aligned or full extent
    per_ch = max(1, N * HW * elem_bytes)
    tc = int(target_bytes // per_ch)
    tc = max(sub, (tc // sub) * sub)         # sublane-aligned, at least one tile
    # Keep >= 2 channel blocks when alignment allows: v7x's second TensorCore
    # gets work and the DMA pipeline has >= 2 steps.
    half = (C // 2 // sub) * sub
    if half >= sub:
        tc = min(tc, half)
    return int(min(tc, C))


def dropblock2d_pol(x, seed_mask, drop_prob, block_size, training=True):
    """Forward pass of DropBlock2D_pol.

    x:         (N, C, H, W) array.
    seed_mask: (N, H, W) float array in {0, 1}, i.e. (rand(N, H, W) < gamma).
    """
    assert x.ndim == 4, "Expected input with 4 dimensions (bsize, channels, height, width)"
    if (not training) or drop_prob == 0.0:
        return x
    N, C, H, W = x.shape
    HW = H * W

    xf = x.reshape(N, C, HW)                              # metadata-only reshape
    mf = seed_mask.astype(jnp.float32).reshape(N, HW)     # metadata-only reshape

    target_bytes, vmem_limit = _generation_budget()
    tc = _pick_channel_tile(N, C, HW, x.dtype.itemsize, target_bytes)

    n_blocks = pl.cdiv(C, tc)
    shards = 2 if n_blocks >= 2 else 1                    # <= #TensorCores (v7x: 2)
    tiles_per_shard = pl.cdiv(n_blocks, shards)
    last_block = n_blocks - 1

    def x_index_map(s, t):
        blk = s * tiles_per_shard + t
        # Clamp the (possibly empty) tail of the last shard back onto the last
        # valid block; the duplicate work rewrites identical values (idempotent)
        # and stays on a single core, so it is race-free.
        return (0, jnp.minimum(blk, last_block), 0)

    # Make sure the scoped VMEM limit covers the actual buffers:
    # in + out double-buffered, resident seed mask, a/b scratch + prologue temps.
    block_bytes = N * tc * HW * x.dtype.itemsize
    mask_bytes = N * HW * 4
    est = 4 * block_bytes + 16 * mask_bytes + (2 << 20)
    vmem_limit = int(min(64 << 20, max(vmem_limit, est)))

    out = pl.pallas_call(
        functools.partial(_dropblock_kernel, H=H, W=W, block_size=block_size),
        grid=(shards, tiles_per_shard),
        out_shape=jax.ShapeDtypeStruct((N, C, HW), x.dtype),
        in_specs=[
            pl.BlockSpec((N, HW), lambda s, t: (0, 0)),       # seed mask, resident
            pl.BlockSpec((N, tc, HW), x_index_map),           # x channel tile
        ],
        out_specs=pl.BlockSpec((N, tc, HW), x_index_map),
        scratch_shapes=[
            pltpu.VMEM((N, HW), jnp.float32),                 # a = keep / pro
            pltpu.VMEM((N, HW), jnp.float32),                 # b = (drop - 1 + pro) / pro
        ],
        compiler_params=pltpu.CompilerParams(
            # Outer shard axis feeds v7x megacore; inner tile axis is the
            # sequential walk that reuses the once-per-core a/b scratch.
            dimension_semantics=("parallel", "arbitrary"),
            vmem_limit_bytes=vmem_limit,
        ),
    )(mf, xf)
    return out.reshape(N, C, H, W)


def _ref_dropblock(x, seed_mask, block_size):
    """Pure-JAX reference mirroring the PyTorch forward."""
    p = block_size // 2
    drop = jax.lax.reduce_window(
        seed_mask, -jnp.inf, jax.lax.max,
        (1, block_size, block_size), (1, 1, 1),
        [(0, 0), (p, p), (p, p)])
    if block_size % 2 == 0:
        drop = drop[:, :-1, :-1]
    keep = 1.0 - drop
    pro = keep.sum() / keep.size
    out = drop[:, None, :, :] + x * keep[:, None, :, :]
    return (out - 1.0 + pro) / pro


if __name__ == "__main__":
    def _run_case(key, N, C, H, W, drop_prob, block_size):
        kx, km = jax.random.split(key)
        x = jax.random.normal(kx, (N, C, H, W), dtype=jnp.float32)
        # gamma = drop_prob / block_size**2 ;  mask = (rand(N, H, W) < gamma)
        gamma = drop_prob / (block_size ** 2)
        seed_mask = (jax.random.uniform(km, (N, H, W)) < gamma).astype(jnp.float32)

        out = dropblock2d_pol(x, seed_mask, drop_prob, block_size, training=True)
        out = jax.block_until_ready(out)

        ref = _ref_dropblock(x, seed_mask, block_size)
        assert out.shape == (N, C, H, W)
        assert jnp.allclose(out, ref, atol=1e-5, rtol=1e-5), \
            f"mismatch vs JAX reference (C={C}, block_size={block_size})"

    key = jax.random.PRNGKey(0)
    k1, k2, k3 = jax.random.split(key, 3)
    _run_case(k1, N=2, C=4, H=16, W=16, drop_prob=0.1, block_size=3)    # single block
    _run_case(k2, N=2, C=8, H=12, W=12, drop_prob=0.2, block_size=4)    # even block size
    _run_case(k3, N=2, C=20, H=16, W=16, drop_prob=0.15, block_size=5)  # 2 shards + ragged tail
    print("KERNEL_OK")
</pallas_src>

<mosaic_0001>
module attributes {stable_mosaic.version = 11 : i64} {
  func.func @_dropblock_kernel(%arg0: i32, %arg1: i32, %arg2: memref<2x256xf32, #tpu.memory_space<vmem>>, %arg3: memref<2x4x256xf32, #tpu.memory_space<vmem>>, %arg4: memref<2x4x256xf32, #tpu.memory_space<vmem>>, %arg5: memref<2x256xf32, #tpu.memory_space<vmem>>, %arg6: memref<2x256xf32, #tpu.memory_space<vmem>>) attributes {dimension_semantics = [#tpu.dimension_semantics<parallel>, #tpu.dimension_semantics<arbitrary>], iteration_bounds = array<i64: 1, 1>, scalar_prefetch = 0 : i64, scratch_operands = 2 : i64, tpu.core_type = #tpu.core_type<tc>, window_params = [{pipeline_mode = #tpu.pipeline_mode<synchronous>, transform_indices = @transform_0, window_bounds = array<i64: 2, 256>}, {transform_indices = @transform_1, window_bounds = array<i64: 2, 4, 256>}, {transform_indices = @transform_2, window_bounds = array<i64: 2, 4, 256>}]} {
    %c0_i32 = arith.constant 0 : i32
    %0 = arith.cmpi eq, %arg1, %c0_i32 : i32
    %1 = arith.extui %0 : i1 to i32
    %c0_i32_0 = arith.constant 0 : i32
    %2 = arith.cmpi ne, %1, %c0_i32_0 : i32
    scf.if %2 {
      %c0_10 = arith.constant 0 : index
      %c0_11 = arith.constant 0 : index
      %13 = vector.load %arg2[%c0_10, %c0_11] : memref<2x256xf32, #tpu.memory_space<vmem>>, vector<2x256xf32>
      %14 = tpu.iota {dimensions = array<i32: 1>} : vector<1x256xi32>
      %c16_i32 = arith.constant 16 : i32
      %c0_i32_12 = arith.constant 0 : i32
      %15 = arith.cmpi eq, %c16_i32, %c0_i32_12 : i32
      %c1_i32 = arith.constant 1 : i32
      %16 = arith.select %15, %c1_i32, %c16_i32 : i32
      %17 = vector.broadcast %16 : i32 to vector<1x256xi32>
      %18 = arith.remsi %14, %17 : vector<1x256xi32>
      %c0_i32_13 = arith.constant 0 : i32
      %19 = vector.broadcast %c0_i32_13 : i32 to vector<1x256xi32>
      %20 = arith.cmpi ne, %18, %19 : vector<1x256xi32>
      %c0_i32_14 = arith.constant 0 : i32
      %21 = vector.broadcast %c0_i32_14 : i32 to vector<1x256xi32>
      %22 = arith.cmpi slt, %18, %21 : vector<1x256xi32>
      %c0_i32_15 = arith.constant 0 : i32
      %23 = arith.cmpi slt, %16, %c0_i32_15 : i32
      %24 = vector.broadcast %23 : i1 to vector<1x256xi1>
      %25 = vector.broadcast %24 : vector<1x256xi1> to vector<1x256xi1>
      %26 = arith.xori %22, %25 : vector<1x256xi1>
      %27 = arith.andi %26, %20 : vector<1x256xi1>
      %28 = vector.broadcast %16 : i32 to vector<1x256xi32>
      %29 = arith.addi %18, %28 : vector<1x256xi32>
      %30 = arith.select %27, %29, %18 : vector<1x256xi1>, vector<1x256xi32>
      %cst = arith.constant 0.000000e+00 : f32
      %31 = vector.broadcast %cst : f32 to vector<2x256xf32>
      %32 = tpu.concatenate %31, %13, %31 in 1 : vector<2x256xf32>, vector<2x256xf32>, vector<2x256xf32> -> vector<2x768xf32>
      %33 = vector.extract_strided_slice %32 {offsets = [0, 255], sizes = [2, 256], strides = [1, 1]} : vector<2x768xf32> to vector<2x256xf32>
      %c-1_i32 = arith.constant -1 : i32
      %34 = vector.broadcast %c-1_i32 : i32 to vector<1x256xi32>
      %35 = arith.addi %30, %34 : vector<1x256xi32>
      %c0_i32_16 = arith.constant 0 : i32
      %36 = vector.broadcast %c0_i32_16 : i32 to vector<1x256xi32>
      %37 = arith.cmpi sge, %35, %36 : vector<1x256xi32>
      %c-1_i32_17 = arith.constant -1 : i32
      %38 = vector.broadcast %c-1_i32_17 : i32 to vector<1x256xi32>
      %39 = arith.addi %30, %38 : vector<1x256xi32>
      %c16_i32_18 = arith.constant 16 : i32
      %40 = vector.broadcast %c16_i32_18 : i32 to vector<1x256xi32>
      %41 = arith.cmpi slt, %39, %40 : vector<1x256xi32>
      %42 = arith.andi %37, %41 : vector<1x256xi1>
      %cst_19 = arith.constant 0.000000e+00 : f32
      %43 = vector.shape_cast %42 : vector<1x256xi1> to vector<1x256xi1>
      %44 = vector.broadcast %43 : vector<1x256xi1> to vector<2x256xi1>
      %45 = vector.broadcast %cst_19 : f32 to vector<2x256xf32>
      %46 = arith.select %44, %33, %45 : vector<2x256xi1>, vector<2x256xf32>
      %47 = arith.maximumf %13, %46 : vector<2x256xf32>
      %48 = vector.extract_strided_slice %32 {offsets = [0, 257], sizes = [2, 256], strides = [1, 1]} : vector<2x768xf32> to vector<2x256xf32>
      %c1_i32_20 = arith.constant 1 : i32
      %49 = vector.broadcast %c1_i32_20 : i32 to vector<1x256xi32>
      %50 = arith.addi %30, %49 : vector<1x256xi32>
      %c0_i32_21 = arith.constant 0 : i32
      %51 = vector.broadcast %c0_i32_21 : i32 to vector<1x256xi32>
      %52 = arith.cmpi sge, %50, %51 : vector<1x256xi32>
      %c1_i32_22 = arith.constant 1 : i32
      %53 = vector.broadcast %c1_i32_22 : i32 to vector<1x256xi32>
      %54 = arith.addi %30, %53 : vector<1x256xi32>
      %c16_i32_23 = arith.constant 16 : i32
      %55 = vector.broadcast %c16_i32_23 : i32 to vector<1x256xi32>
      %56 = arith.cmpi slt, %54, %55 : vector<1x256xi32>
      %57 = arith.andi %52, %56 : vector<1x256xi1>
      %cst_24 = arith.constant 0.000000e+00 : f32
      %58 = vector.shape_cast %57 : vector<1x256xi1> to vector<1x256xi1>
      %59 = vector.broadcast %58 : vector<1x256xi1> to vector<2x256xi1>
      %60 = vector.broadcast %cst_24 : f32 to vector<2x256xf32>
      %61 = arith.select %59, %48, %60 : vector<2x256xi1>, vector<2x256xf32>
      %62 = arith.maximumf %47, %61 : vector<2x256xf32>
      %cst_25 = arith.constant 0.000000e+00 : f32
      %63 = vector.broadcast %cst_25 : f32 to vector<2x256xf32>
      %64 = tpu.concatenate %63, %62, %63 in 1 : vector<2x256xf32>, vector<2x256xf32>, vector<2x256xf32> -> vector<2x768xf32>
      %65 = vector.extract_strided_slice %64 {offsets = [0, 240], sizes = [2, 256], strides = [1, 1]} : vector<2x768xf32> to vector<2x256xf32>
      %66 = arith.maximumf %62, %65 : vector<2x256xf32>
      %67 = vector.extract_strided_slice %64 {offsets = [0, 272], sizes = [2, 256], strides = [1, 1]} : vector<2x768xf32> to vector<2x256xf32>
      %68 = arith.maximumf %66, %67 : vector<2x256xf32>
      %cst_26 = arith.constant 1.000000e+00 : f32
      %69 = vector.broadcast %cst_26 : f32 to vector<2x256xf32>
      %70 = arith.subf %69, %68 : vector<2x256xf32>
      %71 = vector.shape_cast %70 : vector<2x256xf32> to vector<1x2x256xf32>
      %cst_27 = arith.constant dense<0.000000e+00> : vector<1xf32>
      %72 = vector.multi_reduction <add>, %71, %cst_27 [1, 2] : vector<1x2x256xf32> to vector<1xf32>
      %73 = vector.shape_cast %72 : vector<1xf32> to vector<1x1x1xf32>
      %74 = vector.extract %73[0, 0, 0] : f32 from vector<1x1x1xf32>
      %cst_28 = arith.constant 0.001953125 : f32
      %75 = arith.mulf %74, %cst_28 : f32
      %cst_29 = arith.constant 1.000000e+00 : f32
      %76 = arith.divf %cst_29, %75 : f32
      %77 = vector.broadcast %76 : f32 to vector<2x256xf32>
      %78 = arith.mulf %70, %77 : vector<2x256xf32>
      %c0_30 = arith.constant 0 : index
      %c0_31 = arith.constant 0 : index
      %79 = vector.load %arg5[%c0_30, %c0_31] : memref<2x256xf32, #tpu.memory_space<vmem>>, vector<2x256xf32>
      tpu.vector_store %arg5[%c0_30, %c0_31], %78 {strides = array<i32>} : memref<2x256xf32, #tpu.memory_space<vmem>>, vector<2x256xf32>,
      %cst_32 = arith.constant 1.000000e+00 : f32
      %80 = vector.broadcast %cst_32 : f32 to vector<2x256xf32>
      %81 = arith.subf %68, %80 : vector<2x256xf32>
      %82 = vector.broadcast %75 : f32 to vector<2x256xf32>
      %83 = arith.addf %81, %82 : vector<2x256xf32>
      %84 = vector.broadcast %76 : f32 to vector<2x256xf32>
      %85 = arith.mulf %83, %84 : vector<2x256xf32>
      %c0_33 = arith.constant 0 : index
      %c0_34 = arith.constant 0 : index
      %86 = vector.load %arg6[%c0_33, %c0_34] : memref<2x256xf32, #tpu.memory_space<vmem>>, vector<2x256xf32>
      tpu.vector_store %arg6[%c0_33, %c0_34], %85 {strides = array<i32>} : memref<2x256xf32, #tpu.memory_space<vmem>>, vector<2x256xf32>,
    } else {
    }
    %c0 = arith.constant 0 : index
    %c0_1 = arith.constant 0 : index
    %c0_2 = arith.constant 0 : index
    %3 = vector.load %arg3[%c0, %c0_1, %c0_2] : memref<2x4x256xf32, #tpu.memory_space<vmem>>, vector<2x4x256xf32>
    %c0_3 = arith.constant 0 : index
    %c0_4 = arith.constant 0 : index
    %4 = vector.load %arg5[%c0_3, %c0_4] : memref<2x256xf32, #tpu.memory_space<vmem>>, vector<2x256xf32>
    %5 = vector.shape_cast %4 : vector<2x256xf32> to vector<2x1x256xf32>
    %6 = vector.broadcast %5 : vector<2x1x256xf32> to vector<2x4x256xf32>
    %7 = arith.mulf %3, %6 : vector<2x4x256xf32>
    %c0_5 = arith.constant 0 : index
    %c0_6 = arith.constant 0 : index
    %8 = vector.load %arg6[%c0_5, %c0_6] : memref<2x256xf32, #tpu.memory_space<vmem>>, vector<2x256xf32>
    %9 = vector.shape_cast %8 : vector<2x256xf32> to vector<2x1x256xf32>
    %10 = vector.broadcast %9 : vector<2x1x256xf32> to vector<2x4x256xf32>
    %11 = arith.addf %7, %10 : vector<2x4x256xf32>
    %c0_7 = arith.constant 0 : index
    %c0_8 = arith.constant 0 : index
    %c0_9 = arith.constant 0 : index
    %12 = vector.load %arg4[%c0_7, %c0_8, %c0_9] : memref<2x4x256xf32, #tpu.memory_space<vmem>>, vector<2x4x256xf32>
    tpu.vector_store %arg4[%c0_7, %c0_8, %c0_9], %11 {strides = array<i32>} : memref<2x4x256xf32, #tpu.memory_space<vmem>>, vector<2x4x256xf32>,
    return
  }
  func.func @transform_0(%arg0: i32, %arg1: i32) -> (i32, i32) {
    %c0_i32 = arith.constant 0 : i32
    %c0_i32_0 = arith.constant 0 : i32
    %c0_i32_1 = arith.constant 0 : i32
    return %c0_i32, %c0_i32_0 : i32, i32
  }
  func.func @transform_1(%arg0: i32, %arg1: i32) -> (i32, i32, i32) {
    %c1_i32 = arith.constant 1 : i32
    %0 = arith.muli %arg0, %c1_i32 : i32
    %1 = arith.addi %0, %arg1 : i32
    %c0_i32 = arith.constant 0 : i32
    %2 = arith.minsi %1, %c0_i32 : i32
    %c0_i32_0 = arith.constant 0 : i32
    %c0_i32_1 = arith.constant 0 : i32
    %c0_i32_2 = arith.constant 0 : i32
    return %c0_i32_0, %2, %c0_i32_1 : i32, i32, i32
  }
  func.func @transform_2(%arg0: i32, %arg1: i32) -> (i32, i32, i32) {
    %c1_i32 = arith.constant 1 : i32
    %0 = arith.muli %arg0, %c1_i32 : i32
    %1 = arith.addi %0, %arg1 : i32
    %c0_i32 = arith.constant 0 : i32
    %2 = arith.minsi %1, %c0_i32 : i32
    %c0_i32_0 = arith.constant 0 : i32
    %c0_i32_1 = arith.constant 0 : i32
    %c0_i32_2 = arith.constant 0 : i32
    return %c0_i32_0, %2, %c0_i32_1 : i32, i32, i32
  }
}

</mosaic_0001>

<bundles_post_ra>
// kernel: tpu_custom_call.1
= control target key start
LH: loop header
LB: loop body
LE: loop exit
PB: predicated region body
PF: predicated region fallthrough
CT: control target
= control target key end

     0   :  { %7 = vsyncpa [#allocation5], 0  ;;  %s473_s0 = inlined_call_operand.hbm [shape: f32[2,256], index: 0, kind: input, shape index: {}]   ;;  %s474_s1 = inlined_call_operand.hbm [shape: f32[2,4,256], index: 1, kind: input, shape index: {}]   ;;  %s475_s2 = inlined_call_operand.hbm [shape: f32[2,4,256], index: 2, kind: output, shape index: {}]  }
   0x1   :  { %8 = vsyncpa [#allocation8], 0 }
   0x2   :  { %9 = vsyncpa [#allocation6], 0  ;;  %s15_s11 = sshll.u32 %s473_s0, 4  ;;  %s409_s12 = smov [#allocation4]   ;;  %s16_s11 = int_to_ptr.hbm [resolvable:$true] %s15_s11 }
   0x3   :  { %s17_s13 = sshll.u32 %s409_s12, 4  ;;  %s31_s16 = sshll.u32 %s474_s1, 4  ;;  %s18_s13 = int_to_ptr.vmem [resolvable:$true] %s17_s13  ;;  %s32_s16 = int_to_ptr.hbm [resolvable:$true] %s31_s16 }
   0x4   :  { %20 = dma.hbm_to_vmem [thread:$0]  %s16_s11, 64, %s18_s13, [#allocation5]  }
   0x5   :  { %s410_s17 = smov [#allocation7]   ;;  %s411_s19 = smov 128  }
   0x6   :  { %s33_s18 = sshll.u32 %s410_s17, 4  ;;  %s412_s20 = smov 8   ;;  %s34_s18 = int_to_ptr.vmem [resolvable:$true] %s33_s18 }
   0x7   :  { %39 = dma.hbm_to_vmem [thread:$0]  %s32_s16, 256, %s34_s18, [#allocation8], %s411_s19, %s411_s19, %s412_s20  }
   0x8   :  { %403 = dma.done.wait [#allocation5], 64  }
   0x9   :  { %404 = vsyncadd [#allocation5], 4294967232 }
   0xa   :  { %405 = dma.done.wait [#allocation8], 256  }
   0xb   :  { %406 = vsyncadd [#allocation8], 4294967040  ;;  %v413_v0 = vmov 0.0   ;;  %s414_s0 = smov 1   ;;  %s415_s21 = smov 127   ;;  %v59_v4 = vlaneseq  ;;  %vm141_vm0 = vcmask 1039360  }
   0xc   :  { %103 = vrot.lane.b32.xlu1 %v413_v0, %s414_s0  ;;  %139 = vrot.lane.b32.xlu2 %v413_v0, %s415_s21  ;;  %v58_v1 = vld [vmem:[#allocation4] sm:$0xf]  ;;  %vm109_vm2 = vcmask 7168   ;;  %vm119_vm6 = vcmask 1041408   ;;  %v171_v33 = vrot.slane %v413_v0, 4  ;;  %vm161_vm7 = vcmask 1043456  }
   0xd   :  { %87 = vst [vmem:[#allocation1] ss:$4 sm:$0xff] %v58_v1  ;;  %v60_v5 = vand.u32 127, %v59_v4  ;;  %s416_s1 = smov 112   ;;  %s417_s22 = smov 16   ;;  %vm166_vm8 = vcmask 130048  }
   0xe   :  { %vm177_vm9 = vcmask 916480   ;;  %vm232_vm14 = vcmask 1040384   ;;  %vm234_vm15 = vcmask 1042434   ;;  %s418_s26 = smov [#allocation9]   ;;  %s296_s30 = sshll.u32 %s475_s2, 4  ;;  %s297_s30 = int_to_ptr.hbm [resolvable:$true] %s296_s30 }
   0xf   :  { %v61_v7 = vadd.s32 128, %v60_v5  ;;  %v66_v10 = vand.u32 15, %v60_v5  ;;  %s294_s27 = sshll.u32 %s418_s26, 4  ;;  %s295_s27 = int_to_ptr.vmem [resolvable:$true] %s294_s27 }
  0x11   :  { %v73_v9 = vand.u32 15, %v61_v7  ;;  %v90_v15 = vadd.s32 4294967295, %v66_v10  ;;  %v123_v17 = vadd.s32 1, %v66_v10 }
  0x13   :  { %v124_v12 = vadd.s32 1, %v73_v9  ;;  %v91_v14 = vadd.s32 4294967295, %v73_v9  ;;  %vm92_vm4 = vcmp.ge.s32.totalorder %v90_v15, 0  ;;  %vm127_vm5 = vcmp.lt.s32.totalorder %v123_v17, 16 }
  0x14   :  { %v88_v2 = vld.sshfl [vmem:[#allocation1] sm:$0xff pattern:$0x73625140]  ;;  %v89_v3 = vld.sshfl [vmem:[#allocation1 + $0x8] sm:$0xff pattern:$0x73625140] }
  0x15   :  { %105 = vrot.lane.b32.xlu0 %v88_v2, %s414_s0  ;;  %137 = vrot.lane.b32.xlu1 %v89_v3, %s415_s21  ;;  %vm128_vm1 = vcmp.lt.s32.totalorder %v124_v12, 16  ;;  %vm93_vm3 = vcmp.ge.s32.totalorder %v91_v14, 0 }
  0x16   :  { %135 = vrot.lane.b32.xlu2 %v88_v2, %s415_s21 }
  0x1d   :  { %107 = vrot.lane.b32.xlu0 %v89_v3, %s414_s0 }
  0x66   :  { %v140_v8 = vpop.permute.xlu2 %139 }
  0x70   :  { %v136_v18 = vpop.permute.xlu2 %135 }
  0x7e   :  { %v104_v6 = vpop.permute.xlu1 %103 }
  0x87   :  { %v106_v11 = vpop.permute.xlu0 %105  ;;  %v138_v13 = vpop.permute.xlu1 %137 }
  0x88   :  { %v143_v16 = vsel %vm141_vm0, %v138_v13, %v140_v8  ;;  %v110_v21 = vsel %vm109_vm2, %v104_v6, %v106_v11  ;;  %v142_v22 = vsel %vm141_vm0, %v136_v18, %v138_v13  ;;  %vm238_vm0 = vcmask 1041409  }
  0x89   :  { %v147_v19 = vsel %vm128_vm1, %v143_v16, 0.0  ;;  %v114_v27 = vsel %vm92_vm4, %v110_v21, 0.0  ;;  %v146_v28 = vsel %vm127_vm5, %v142_v22, 0.0  ;;  %vm240_vm1 = vcmask 1043459  }
  0x8a   :  { %v150_v25 = vrot.slane %v147_v19, 6 }
  0x8c   :  { %v151_v31 = vsel %vm119_vm6, %v146_v28, %v150_v25 }
  0x8f   :  { %v108_v20 = vpop.permute.xlu0 %107 }
  0x90   :  { %v111_v23 = vsel %vm109_vm2, %v106_v11, %v108_v20  ;;  %vm242_vm2 = vcmask 1042433  }
  0x91   :  { %v115_v24 = vsel %vm93_vm3, %v111_v23, 0.0 }
  0x92   :  { %v118_v26 = vrot.slane %v115_v24, 6 }
  0x94   :  { %v120_v29 = vsel %vm119_vm6, %v114_v27, %v118_v26 }
  0x95   :  { %v122_v30 = vmax.f32 %v58_v1, %v120_v29 }
  0x97   :  { %v153_v32 = vmax.f32 %v122_v30, %v151_v31 }
  0x99   :  { %155 = vst [vmem:[#allocation1] ss:$4 sm:$0xff] %v153_v32 }
  0xa0   :  { %v156_v34 = vld.sshfl [vmem:[#allocation1] sm:$0xff pattern:$0x73625140]  ;;  %v157_v35 = vld.sshfl [vmem:[#allocation1 + $0x8] sm:$0xff pattern:$0x73625140] }
  0xa1   :  { %v170_v36 = vrot.slane %v157_v35, 6  ;;  %v158_v37 = vrot.slane %v156_v34, 6  ;;  %v159_v38 = vrot.slane %v157_v35, 4 }
  0xa3   :  { %v172_v39 = vsel %vm119_vm6, %v156_v34, %v170_v36  ;;  %v160_v40 = vsel %vm119_vm6, 0.0, %v158_v37 }
  0xa4   :  { %v173_v41 = vsel %vm161_vm7, %v172_v39, %v171_v33  ;;  %v162_v42 = vsel %vm161_vm7, %v160_v40, %v159_v38  ;;  %v225_v38 = vld [vmem:[#allocation7] sm:$0xff] }
  0xa5   :  { %174 = vrot.lane.b32.xlu1 %v173_v41, %s416_s1  ;;  %163 = vrot.lane.b32.xlu0 %v162_v42, %s417_s22 }
 0x117   :  { %v175_v43 = vpop.permute.xlu1 %174  ;;  %v164_v44 = vpop.permute.xlu0 %163 }
 0x118   :  { %v176_v45 = vrot.slane %v175_v43, 2  ;;  %v165_v46 = vrot.slane %v164_v44, 2 }
 0x11a   :  { %v167_v47 = vsel %vm166_vm8, %v164_v44, %v165_v46  ;;  %v178_v49 = vsel %vm177_vm9, %v175_v43, %v176_v45  ;;  %v226_v45 = vld [vmem:[#allocation7 + $0x8] sm:$0xff] }
 0x11b   :  { %v169_v48 = vmax.f32 %v153_v32, %v167_v47 }
 0x11d   :  { %v180_v50 = vmax.f32 %v169_v48, %v178_v49 }
 0x11f   :  { %v181_v51 = vsub.f32 1.0, %v180_v50  ;;  %v314_v1 = vadd.f32 -1.0, %v180_v50 }
 0x121   :  { %183 = vst [vmem:[#allocation1] ss:$4 sm:$0xff] %v181_v51 }
 0x128   :  { %v184_v52 = vld.sshfl [vmem:[#allocation1] sm:$0xff pattern:$0x73625140]  ;;  %v185_v53 = vld.sshfl [vmem:[#allocation1 + $0x8] sm:$0xff pattern:$0x73625140] }
 0x129   :  { %v188_v54 = vsel %vm119_vm6, %v184_v52, 0.0  ;;  %v189_v55 = vsel %vm119_vm6, %v185_v53, 0.0 }
 0x12a   :  { %v190_v56 = vadd.f32 %v189_v55, %v188_v54 }
 0x12c   :  { %191 = vadd.xlane.f32.xlu2 %v190_v56 }
 0x19f   :  { %v192_v57 = vpop.xlane.xlu2 %191 }
 0x1a0   :  { %v193_v58 = vrot.slane %v192_v57, 4 }
 0x1a2   :  { %v194_v59 = vadd.f32 %v193_v58, %v192_v57 }
 0x1a4   :  { %v195_v60 = vrot.slane %v194_v59, 2 }
 0x1a6   :  { %v196_v61 = vadd.f32 %v195_v60, %v194_v59 }
 0x1a8   :  { %v197_v62 = vrot.slane %v196_v61, 1 }
 0x1aa   :  { %v198_v63 = vadd.f32 %v197_v62, %v196_v61 }
 0x1ac   :  { %315 = vpush %v198_v63 }
 0x1dd   :  { %s316_s23 = spop %315 }
 0x1de   :  { %s200_s24 = smul.f32 0.001953125, %s316_s23 }
 0x1e0   :  { %v201_v0 = vstv %s200_s24 }
 0x1e1   :  { %329 = vrcp.f32 %v201_v0  ;;  %v222_v2 = vadd.f32 %v314_v1, %v201_v0  ;;  %v213_v6 = vand.u32 2147483648, %v201_v0  ;;  %v211_v8 = vand.u32 2147483647, %v201_v0 }
 0x1e2   :  { %vm207_vm11 = vweird.f32 %v201_v0 }
 0x1e3   :  { %v214_v10 = vor.u32 1.1754944e-38, %v213_v6  ;;  %vm212_vm13 = vcmp.eq.f32.partialorder %v211_v8, 8.507059e+37 }
 0x1e7   :  { %v330_v3 = vpop.eup %329 }
 0x1e8   :  { %v203_v4 = vmul.f32 %v330_v3, %v201_v0  ;;  %vm208_vm10 = vweird.f32 %v330_v3 }
 0x1e9   :  { %vm209_vm12 = vmor %vm207_vm11, %vm208_vm10 }
 0x1ea   :  { %v204_v5 = vsub.f32 1.0, %v203_v4 }
 0x1ec   :  { %v205_v7 = vmul.f32 %v330_v3, %v204_v5 }
 0x1ee   :  { %v206_v9 = vadd.f32 %v330_v3, %v205_v7 }
 0x1f0   :  { %v210_v11 = vsel %vm209_vm12, %v330_v3, %v206_v9 }
 0x1f1   :  { %v215_v12 = vsel %vm212_vm13, %v214_v10, %v210_v11 }
 0x1f2   :  { %317 = vpush %v215_v12 }
 0x223   :  { %s318_s25 = spop %317 }
 0x224   :  { %v217_v13 = vstv %s318_s25 }
 0x225   :  { %v218_v14 = vmul.f32 %v217_v13, %v181_v51  ;;  %v223_v15 = vmul.f32 %v222_v2, %v217_v13 }
 0x227   :  { %219 = vst [vmem:[#allocation2] sm:$0xf] %v218_v14 }
 0x228   :  { %224 = vst [vmem:[#allocation3] sm:$0xf] %v223_v15 }
 0x22e   :  { %v227_v16 = vld [vmem:[#allocation2] sm:$0xf] }
 0x22f   :  { %v229_v17 = vrot.slane %v227_v16, 1  ;;  %v230_v18 = vrot.slane %v227_v16, 2  ;;  %v231_v19 = vrot.slane %v227_v16, 3  ;;  %v258_v20 = vld [vmem:[#allocation3] sm:$0xf] }
 0x230   :  { %v260_v21 = vrot.slane %v258_v20, 1  ;;  %v261_v22 = vrot.slane %v258_v20, 2  ;;  %v262_v23 = vrot.slane %v258_v20, 3 }
 0x231   :  { %v233_v24 = vsel %vm232_vm14, %v227_v16, %v229_v17  ;;  %v235_v25 = vsel %vm234_vm15, %v230_v18, %v231_v19  ;;  %v239_v26 = vsel %vm238_vm0, %v227_v16, %v229_v17  ;;  %v241_v27 = vsel %vm240_vm1, %v230_v18, %v231_v19 }
 0x232   :  { %v237_v28 = vsel %vm119_vm6, %v233_v24, %v235_v25  ;;  %v243_v29 = vsel %vm242_vm2, %v239_v26, %v241_v27  ;;  %v263_v30 = vsel %vm232_vm14, %v258_v20, %v260_v21  ;;  %v264_v31 = vsel %vm234_vm15, %v261_v22, %v262_v23 }
 0x233   :  { %v244_v32 = vrot.slane %v243_v29, 1  ;;  %v246_v33 = vperm.slane %v237_v28, 1  ;;  %v265_v34 = vsel %vm119_vm6, %v263_v30, %v264_v31  ;;  %v266_v35 = vsel %vm238_vm0, %v258_v20, %v260_v21 }
 0x234   :  { %v267_v36 = vsel %vm240_vm1, %v261_v22, %v262_v23  ;;  %v271_v37 = vperm.slane %v265_v34, 1  ;;  %v245_v39 = vperm.slane %v237_v28, 0  ;;  %v270_v49 = vperm.slane %v265_v34, 0 }
 0x235   :  { %v248_v40 = vperm.slane %v244_v32, 1  ;;  %v249_v41 = vrot.slane %v246_v33, 4  ;;  %v268_v42 = vsel %vm242_vm2, %v266_v35, %v267_v36  ;;  %v247_v46 = vperm.slane %v244_v32, 0 }
 0x236   :  { %v269_v43 = vrot.slane %v268_v42, 1  ;;  %v274_v44 = vrot.slane %v271_v37, 4 }
 0x237   :  { %v250_v47 = vrot.slane %v248_v40, 4  ;;  %v252_v48 = vsel %vm161_vm7, %v245_v39, %v249_v41 }
 0x238   :  { %v256_v50 = vmul.f32 %v252_v48, %v225_v38  ;;  %v273_v51 = vperm.slane %v269_v43, 1  ;;  %v276_v53 = vsel %vm161_vm7, %v270_v49, %v274_v44  ;;  %v272_v55 = vperm.slane %v269_v43, 0 }
 0x239   :  { %v253_v52 = vsel %vm161_vm7, %v247_v46, %v250_v47 }
 0x23a   :  { %v257_v54 = vmul.f32 %v253_v52, %v226_v45  ;;  %v275_v56 = vrot.slane %v273_v51, 4  ;;  %v280_v57 = vadd.f32 %v276_v53, %v256_v50 }
 0x23c   :  { %v277_v58 = vsel %vm161_vm7, %v272_v55, %v275_v56  ;;  %282 = vst [vmem:[#allocation9] sm:$0xff] %v280_v57 }
 0x23d   :  { %v281_v59 = vadd.f32 %v277_v58, %v257_v54 }
 0x23f   :  { %283 = vst [vmem:[#allocation9 + $0x8] sm:$0xff] %v281_v59 }
 0x240   :  { %302 = dma.vmem_to_hbm [thread:$0]  %s295_s27, 256, %s297_s30, [#allocation6], %s411_s19, %s411_s19, %s412_s20  }
 0x241   :  { %407 = dma.done.wait [#allocation6], 256  }
 0x242   :  { %408 = vsyncadd [#allocation6], 4294967040 }
 0x243   :  { %307 = vsyncpa [#allocation5], 1 }
 0x244   :  { %308 = vsyncpa [#allocation8], 1 }
 0x245   :  { %309 = vsyncpa [#allocation6], 1 }

</bundles_post_ra>
